<compile_context>
chip_gen: v7x
topology: tpu7x:2x2x1
jax: 0.10.0
libtpu: 0.0.40
codegen_flags: <defaults>
</compile_context>

<pallas_src>
import jax
import jax.numpy as jnp
from jax.experimental import pallas as pl
from jax.experimental.pallas import tpu as pltpu

HIDDEN = 128
NUM_ACTIONS = 6
NUM_LAYERS = 3


def _cdiv(a, b):
    return (a + b - 1) // b


def _round_up(x, m):
    return ((x + m - 1) // m) * m


def _choose_tile(B, max_tile_b=512, min_steps=2):
    """Pick tile_b = round_up(cdiv(B, n_steps), 8) with n_steps >= 2 when B allows.

    Keeps ragged padding < tile_b rows (cheap vs. padding to a fixed 512) and
    gives >= 2 parallel grid steps so a 2-TC chip (v7x) shards the batch axis.
    """
    n_steps = max(_cdiv(B, max_tile_b), min(min_steps, _cdiv(B, 8)))
    tile_b = _round_up(_cdiv(B, n_steps), 8)
    Bp = _round_up(B, tile_b)
    return tile_b, Bp


# ---------------------------------------------------------------------------
# Kernels
# ---------------------------------------------------------------------------

def _one_hot_bf16(a_ref):
    """Build the one-hot in-kernel from int32 action ids: [TB, 6] bf16."""
    tb = a_ref.shape[0]
    lane = jax.lax.broadcasted_iota(jnp.int32, (tb, NUM_ACTIONS), 1)
    return (lane == a_ref[...]).astype(jnp.bfloat16)


def _layers(oh, x, wl_ref, wp_ref):
    """Shared body: hoisted one-hot projection + 3x(128x128 bf16 matmul, relu).

    oh     : [TB, 6]       bf16 one-hot
    x      : [TB, 128]     bf16 activations
    wl_ref : [3, 128, 128] bf16 hidden->hidden weights ([in, out] layout)
    wp_ref : [6, 384]      bf16 one-hot projections, biases folded in,
                           layers concatenated along the lane axis.
    """
    # One K=6 bf16 matmul covering all 3 layers -> [TB, 3*128] f32.
    p_all = jnp.dot(oh, wp_ref[...], preferred_element_type=jnp.float32)
    for l in range(NUM_LAYERS):
        y = jnp.dot(x, wl_ref[l], preferred_element_type=jnp.float32)
        y = y + p_all[:, l * HIDDEN:(l + 1) * HIDDEN]
        x = jnp.maximum(y, 0.0).astype(jnp.bfloat16)
    return x


def rnn_kernel(a_ref, h_ref, wl_ref, wp_ref, o_ref):
    """Single-step forward on one batch tile.

    a_ref : [TB, 1]   int32 action ids
    h_ref : [TB, 128] bf16 hidden state
    o_ref : [TB, 128] bf16 output (lane-dense store)
    """
    o_ref[...] = _layers(_one_hot_bf16(a_ref), h_ref[...], wl_ref, wp_ref)


def rnn_unroll_kernel(a_ref, h_ref, wl_ref, wp_ref, o_ref, h_sc):
    """T-step MuZero unroll: hidden carried in VMEM scratch across the time axis.

    Grid is (batch_tiles, T); batch axis "parallel", time axis "arbitrary".
    a_ref : [TB, 1] int32 action for this step (time dim squeezed by BlockSpec)
    h_sc  : [TB, 128] bf16 VMEM scratch holding the running hidden state.
    """
    t = pl.program_id(1)

    @pl.when(t == 0)
    def _():
        h_sc[...] = h_ref[...]

    h_sc[...] = _layers(_one_hot_bf16(a_ref), h_sc[...], wl_ref, wp_ref)

    @pl.when(t == pl.num_programs(1) - 1)
    def _():
        o_ref[...] = h_sc[...]


# ---------------------------------------------------------------------------
# Wrappers
# ---------------------------------------------------------------------------

def rnn_forward(hidden, action, packed_params, *, max_tile_b=512):
    """One RNN step.  hidden: [B, 128] (bf16 preferred), action: [B] int in [0, 6).

    Returns [B, 128] bf16.  Keep activations bf16 in the caller to realize the
    bandwidth win (a wrapper-side cast would just move the HBM traffic).
    """
    wl, wp = packed_params
    B = hidden.shape[0]
    hidden = hidden.astype(jnp.bfloat16)

    tile_b, Bp = _choose_tile(B, max_tile_b)
    if Bp != B:                                  # pad ragged last tile
        hidden = jnp.pad(hidden, ((0, Bp - B), (0, 0)))
        action = jnp.pad(action, (0, Bp - B))
    a2d = action.astype(jnp.int32).reshape(Bp, 1)

    out = pl.pallas_call(
        rnn_kernel,
        out_shape=jax.ShapeDtypeStruct((Bp, HIDDEN), jnp.bfloat16),
        grid=(Bp // tile_b,),
        in_specs=[
            pl.BlockSpec((tile_b, 1), lambda i: (i, 0)),
            pl.BlockSpec((tile_b, HIDDEN), lambda i: (i, 0)),
            # Weights: constant index_map -> fetched once, VMEM-resident across grid.
            pl.BlockSpec((NUM_LAYERS, HIDDEN, HIDDEN), lambda i: (0, 0, 0)),
            pl.BlockSpec((NUM_ACTIONS, NUM_LAYERS * HIDDEN), lambda i: (0, 0)),
        ],
        out_specs=pl.BlockSpec((tile_b, HIDDEN), lambda i: (i, 0)),
        compiler_params=pltpu.CompilerParams(
            dimension_semantics=("parallel",)),
    )(a2d, hidden, wl, wp)
    return out if Bp == B else out[:B]


def rnn_unroll(hidden, actions, packed_params, *, max_tile_b=512):
    """T-step unroll.  hidden: [B, 128], actions: [T, B].  Returns final hidden [B, 128] bf16.

    Hidden state stays resident in VMEM scratch across the T steps (single
    pallas_call), so HBM only sees the initial hidden load and the final store.
    """
    wl, wp = packed_params
    T, B = actions.shape
    hidden = hidden.astype(jnp.bfloat16)

    tile_b, Bp = _choose_tile(B, max_tile_b)
    if Bp != B:
        hidden = jnp.pad(hidden, ((0, Bp - B), (0, 0)))
        actions = jnp.pad(actions, ((0, 0), (0, Bp - B)))
    a3d = actions.astype(jnp.int32).reshape(T, Bp, 1)

    out = pl.pallas_call(
        rnn_unroll_kernel,
        out_shape=jax.ShapeDtypeStruct((Bp, HIDDEN), jnp.bfloat16),
        grid=(Bp // tile_b, T),
        in_specs=[
            pl.BlockSpec((None, tile_b, 1), lambda i, t: (t, i, 0)),
            pl.BlockSpec((tile_b, HIDDEN), lambda i, t: (i, 0)),
            pl.BlockSpec((NUM_LAYERS, HIDDEN, HIDDEN), lambda i, t: (0, 0, 0)),
            pl.BlockSpec((NUM_ACTIONS, NUM_LAYERS * HIDDEN), lambda i, t: (0, 0)),
        ],
        out_specs=pl.BlockSpec((tile_b, HIDDEN), lambda i, t: (i, 0)),
        scratch_shapes=[pltpu.VMEM((tile_b, HIDDEN), jnp.bfloat16)],
        compiler_params=pltpu.CompilerParams(
            dimension_semantics=("parallel", "arbitrary")),
    )(a3d, hidden, wl, wp)
    return out if Bp == B else out[:B]


# ---------------------------------------------------------------------------
# Parameter construction (synthetic, deterministic) and pure-JAX reference.
# ---------------------------------------------------------------------------

def init_raw_params(key):
    """Per layer: (Wl [128,128], bl [128], Wp [6,128], bp [128]), all f32, [in,out]."""
    def linear(k, n_in, n_out):
        k1, k2 = jax.random.split(k)
        bound = 1.0 / jnp.sqrt(n_in)
        w = jax.random.uniform(k1, (n_in, n_out), jnp.float32, -bound, bound)
        b = jax.random.uniform(k2, (n_out,), jnp.float32, -bound, bound)
        return w, b

    keys = jax.random.split(key, 2 * NUM_LAYERS)
    raw = []
    for l in range(NUM_LAYERS):
        wl, bl = linear(keys[2 * l], HIDDEN, HIDDEN)
        wp, bp = linear(keys[2 * l + 1], NUM_ACTIONS, HIDDEN)
        raw.append((wl, bl, wp, bp))
    return raw


def pack_params(raw):
    """Kernel params: bf16 weight stack [3,128,128] + bf16 bias-folded one-hot
    projections concatenated over layers [6, 3*128].
    Fold is exact in f32 (each one-hot row sums to 1), then rounded once to bf16.
    """
    wl = jnp.stack([w for (w, _, _, _) in raw]).astype(jnp.bfloat16)        # [3,128,128]
    wp = jnp.concatenate(
        [wp_ + (bl_ + bp_)[None, :] for (_, bl_, wp_, bp_) in raw], axis=1
    ).astype(jnp.bfloat16)                                                   # [6, 384]
    return wl, wp


def rnn_ref(hidden, action, raw):
    """Pure-JAX f32 reference matching the PyTorch forward."""
    oh = jax.nn.one_hot(action, NUM_ACTIONS, dtype=jnp.float32)
    x = hidden
    for (wl_, bl_, wp_, bp_) in raw:
        x = jax.nn.relu(x @ wl_ + bl_ + oh @ wp_ + bp_)
    return x


if __name__ == "__main__":
    key = jax.random.PRNGKey(0)
    kp, kh, ka = jax.random.split(key, 3)

    raw = init_raw_params(kp)
    packed = pack_params(raw)

    # ---- Small single-tile case ------------------------------------------
    B = 8
    hidden = jax.random.normal(kh, (B, HIDDEN), jnp.float32).astype(jnp.bfloat16)
    action = jax.random.randint(ka, (B,), 0, NUM_ACTIONS, jnp.int32)

    out = jax.block_until_ready(rnn_forward(hidden, action, packed))
    ref = rnn_ref(hidden.astype(jnp.float32), action, raw)
    assert out.shape == (B, HIDDEN) and out.dtype == jnp.bfloat16
    assert jnp.allclose(out.astype(jnp.float32), ref, atol=5e-2, rtol=5e-2), \
        "mismatch vs reference (B=8)"

    # ---- Multi-tile grid (>=2 parallel steps) + ragged padding ------------
    B2 = 136
    kh2, ka2 = jax.random.split(jax.random.PRNGKey(1))
    hidden2 = jax.random.normal(kh2, (B2, HIDDEN), jnp.float32).astype(jnp.bfloat16)
    action2 = jax.random.randint(ka2, (B2,), 0, NUM_ACTIONS, jnp.int32)

    out2 = jax.block_until_ready(rnn_forward(hidden2, action2, packed))
    ref2 = rnn_ref(hidden2.astype(jnp.float32), action2, raw)
    assert out2.shape == (B2, HIDDEN)
    assert jnp.allclose(out2.astype(jnp.float32), ref2, atol=5e-2, rtol=5e-2), \
        "mismatch vs reference (B=136)"

    # ---- Unrolled variant: T steps, hidden resident in VMEM ---------------
    T, B3 = 4, 24
    kh3, ka3 = jax.random.split(jax.random.PRNGKey(2))
    hidden3 = jax.random.normal(kh3, (B3, HIDDEN), jnp.float32).astype(jnp.bfloat16)
    actions3 = jax.random.randint(ka3, (T, B3), 0, NUM_ACTIONS, jnp.int32)

    out3 = jax.block_until_ready(rnn_unroll(hidden3, actions3, packed))
    ref3 = hidden3.astype(jnp.float32)
    for t in range(T):
        ref3 = rnn_ref(ref3, actions3[t], raw)
    assert out3.shape == (B3, HIDDEN)
    assert jnp.allclose(out3.astype(jnp.float32), ref3, atol=5e-2, rtol=5e-2), \
        "mismatch vs reference (unroll T=4)"

    print("KERNEL_OK")
</pallas_src>

<mosaic_0001>
module attributes {stable_mosaic.version = 11 : i64} {
  func.func @rnn_kernel(%arg0: i32, %arg1: memref<8x1xi32, #tpu.memory_space<vmem>>, %arg2: memref<8x128xbf16, #tpu.memory_space<vmem>>, %arg3: memref<3x128x128xbf16, #tpu.memory_space<vmem>>, %arg4: memref<6x384xbf16, #tpu.memory_space<vmem>>, %arg5: memref<8x128xbf16, #tpu.memory_space<vmem>>) attributes {dimension_semantics = [#tpu.dimension_semantics<parallel>], iteration_bounds = array<i64: 1>, scalar_prefetch = 0 : i64, scratch_operands = 0 : i64, tpu.core_type = #tpu.core_type<tc>, window_params = [{transform_indices = @transform_0, window_bounds = array<i64: 8, 1>}, {transform_indices = @transform_1, window_bounds = array<i64: 8, 128>}, {pipeline_mode = #tpu.pipeline_mode<synchronous>, transform_indices = @transform_2, window_bounds = array<i64: 3, 128, 128>}, {pipeline_mode = #tpu.pipeline_mode<synchronous>, transform_indices = @transform_3, window_bounds = array<i64: 6, 384>}, {transform_indices = @transform_4, window_bounds = array<i64: 8, 128>}]} {
    %0 = tpu.iota {dimensions = array<i32: 1>} : vector<8x6xi32>
    %c0 = arith.constant 0 : index
    %c0_0 = arith.constant 0 : index
    %1 = vector.load %arg1[%c0, %c0_0] : memref<8x1xi32, #tpu.memory_space<vmem>>, vector<8x1xi32>
    %2 = vector.broadcast %1 : vector<8x1xi32> to vector<8x6xi32>
    %3 = arith.cmpi eq, %0, %2 : vector<8x6xi32>
    %4 = arith.extui %3 : vector<8x6xi1> to vector<8x6xi32>
    %5 = arith.sitofp %4 : vector<8x6xi32> to vector<8x6xf32>
    %6 = arith.truncf %5 : vector<8x6xf32> to vector<8x6xbf16>
    %c0_1 = arith.constant 0 : index
    %c0_2 = arith.constant 0 : index
    %7 = vector.load %arg2[%c0_1, %c0_2] : memref<8x128xbf16, #tpu.memory_space<vmem>>, vector<8x128xbf16>
    %c0_3 = arith.constant 0 : index
    %c0_4 = arith.constant 0 : index
    %8 = vector.load %arg4[%c0_3, %c0_4] : memref<6x384xbf16, #tpu.memory_space<vmem>>, vector<6x384xbf16>
    %cst = arith.constant dense<0.000000e+00> : vector<8x384xf32>
    %9 = tpu.matmul %6, %8, %cst {dimension_numbers = #tpu.dot_dimension_numbers<[1], [0], [0], [1], [0, 0, 1, 1], [], []>} : vector<8x6xbf16>, vector<6x384xbf16>, vector<8x384xf32> -> vector<8x384xf32>
    %c0_5 = arith.constant 0 : index
    %c0_6 = arith.constant 0 : index
    %c0_7 = arith.constant 0 : index
    %10 = vector.load %arg3[%c0_5, %c0_6, %c0_7] : memref<3x128x128xbf16, #tpu.memory_space<vmem>>, vector<1x128x128xbf16>
    %11 = vector.shape_cast %10 : vector<1x128x128xbf16> to vector<128x128xbf16>
    %cst_8 = arith.constant dense<0.000000e+00> : vector<8x128xf32>
    %12 = tpu.matmul %7, %11, %cst_8 {dimension_numbers = #tpu.dot_dimension_numbers<[1], [0], [0], [1], [0, 0, 1, 1], [], []>} : vector<8x128xbf16>, vector<128x128xbf16>, vector<8x128xf32> -> vector<8x128xf32>
    %13 = vector.extract_strided_slice %9 {offsets = [0, 0], sizes = [8, 128], strides = [1, 1]} : vector<8x384xf32> to vector<8x128xf32>
    %14 = arith.addf %12, %13 : vector<8x128xf32>
    %cst_9 = arith.constant 0.000000e+00 : f32
    %15 = vector.broadcast %cst_9 : f32 to vector<8x128xf32>
    %16 = arith.maximumf %14, %15 : vector<8x128xf32>
    %17 = arith.truncf %16 : vector<8x128xf32> to vector<8x128xbf16>
    %c1 = arith.constant 1 : index
    %c0_10 = arith.constant 0 : index
    %c0_11 = arith.constant 0 : index
    %18 = vector.load %arg3[%c1, %c0_10, %c0_11] : memref<3x128x128xbf16, #tpu.memory_space<vmem>>, vector<1x128x128xbf16>
    %19 = vector.shape_cast %18 : vector<1x128x128xbf16> to vector<128x128xbf16>
    %cst_12 = arith.constant dense<0.000000e+00> : vector<8x128xf32>
    %20 = tpu.matmul %17, %19, %cst_12 {dimension_numbers = #tpu.dot_dimension_numbers<[1], [0], [0], [1], [0, 0, 1, 1], [], []>} : vector<8x128xbf16>, vector<128x128xbf16>, vector<8x128xf32> -> vector<8x128xf32>
    %21 = vector.extract_strided_slice %9 {offsets = [0, 128], sizes = [8, 128], strides = [1, 1]} : vector<8x384xf32> to vector<8x128xf32>
    %22 = arith.addf %20, %21 : vector<8x128xf32>
    %cst_13 = arith.constant 0.000000e+00 : f32
    %23 = vector.broadcast %cst_13 : f32 to vector<8x128xf32>
    %24 = arith.maximumf %22, %23 : vector<8x128xf32>
    %25 = arith.truncf %24 : vector<8x128xf32> to vector<8x128xbf16>
    %c2 = arith.constant 2 : index
    %c0_14 = arith.constant 0 : index
    %c0_15 = arith.constant 0 : index
    %26 = vector.load %arg3[%c2, %c0_14, %c0_15] : memref<3x128x128xbf16, #tpu.memory_space<vmem>>, vector<1x128x128xbf16>
    %27 = vector.shape_cast %26 : vector<1x128x128xbf16> to vector<128x128xbf16>
    %cst_16 = arith.constant dense<0.000000e+00> : vector<8x128xf32>
    %28 = tpu.matmul %25, %27, %cst_16 {dimension_numbers = #tpu.dot_dimension_numbers<[1], [0], [0], [1], [0, 0, 1, 1], [], []>} : vector<8x128xbf16>, vector<128x128xbf16>, vector<8x128xf32> -> vector<8x128xf32>
    %29 = vector.extract_strided_slice %9 {offsets = [0, 256], sizes = [8, 128], strides = [1, 1]} : vector<8x384xf32> to vector<8x128xf32>
    %30 = arith.addf %28, %29 : vector<8x128xf32>
    %cst_17 = arith.constant 0.000000e+00 : f32
    %31 = vector.broadcast %cst_17 : f32 to vector<8x128xf32>
    %32 = arith.maximumf %30, %31 : vector<8x128xf32>
    %33 = arith.truncf %32 : vector<8x128xf32> to vector<8x128xbf16>
    %c0_18 = arith.constant 0 : index
    %c0_19 = arith.constant 0 : index
    %34 = vector.load %arg5[%c0_18, %c0_19] : memref<8x128xbf16, #tpu.memory_space<vmem>>, vector<8x128xbf16>
    tpu.vector_store %arg5[%c0_18, %c0_19], %33 {strides = array<i32>} : memref<8x128xbf16, #tpu.memory_space<vmem>>, vector<8x128xbf16>,
    return
  }
  func.func @transform_0(%arg0: i32) -> (i32, i32) {
    %c0_i32 = arith.constant 0 : i32
    %c0_i32_0 = arith.constant 0 : i32
    return %arg0, %c0_i32 : i32, i32
  }
  func.func @transform_1(%arg0: i32) -> (i32, i32) {
    %c0_i32 = arith.constant 0 : i32
    %c0_i32_0 = arith.constant 0 : i32
    return %arg0, %c0_i32 : i32, i32
  }
  func.func @transform_2(%arg0: i32) -> (i32, i32, i32) {
    %c0_i32 = arith.constant 0 : i32
    %c0_i32_0 = arith.constant 0 : i32
    %c0_i32_1 = arith.constant 0 : i32
    %c0_i32_2 = arith.constant 0 : i32
    return %c0_i32, %c0_i32_0, %c0_i32_1 : i32, i32, i32
  }
  func.func @transform_3(%arg0: i32) -> (i32, i32) {
    %c0_i32 = arith.constant 0 : i32
    %c0_i32_0 = arith.constant 0 : i32
    %c0_i32_1 = arith.constant 0 : i32
    return %c0_i32, %c0_i32_0 : i32, i32
  }
  func.func @transform_4(%arg0: i32) -> (i32, i32) {
    %c0_i32 = arith.constant 0 : i32
    %c0_i32_0 = arith.constant 0 : i32
    return %arg0, %c0_i32 : i32, i32
  }
}

</mosaic_0001>

<bundles_post_ra>
// kernel: tpu_custom_call.1
= control target key start
LH: loop header
LB: loop body
LE: loop exit
PB: predicated region body
PF: predicated region fallthrough
CT: control target
= control target key end

     0   :  { %9 = vsyncpa [#allocation3], 0  ;;  %s800_s0 = inlined_call_operand.vmem [shape: s32[8,1], index: 0, kind: input, shape index: {}]   ;;  %s801_s1 = inlined_call_operand.vmem [shape: bf16[8,128], index: 1, kind: input, shape index: {}]   ;;  %s802_s2 = inlined_call_operand.hbm [shape: bf16[3,128,128], index: 2, kind: input, shape index: {}]   ;;  %s803_s3 = inlined_call_operand.vmem [shape: bf16[6,384], index: 3, kind: input, shape index: {}]   ;;  %s804_s4 = inlined_call_operand.hbm [shape: bf16[8,128], index: 4, kind: output, shape index: {}]  }
   0x1   :  { %10 = vsyncpa [#allocation4], 0  ;;  %s695_s15 = smov [#allocation2]   ;;  %s647_s19 = scalar_lea.hbm %s802_s2, 3072 }
   0x2   :  { %s20_s16 = sshll.u32 %s695_s15, 4  ;;  %p648_p0 = scmp.ne.s32.totalorder %s802_s2, %s647_s19  ;;  %s21_s16 = int_to_ptr.vmem [resolvable:$true] %s20_s16 }
   0x3   :  { %p651_p1 = scmp.lt.u32.totalorder %s647_s19, %s802_s2 }
   0x5   :  { %p653_p2 = pnand %p651_p1, %p648_p0 }
   0x7   :  { %656 = shalt.err (!%p653_p2)
}
   0x8   :  { %s657_s24 = scalar_lea.vmem %s21_s16, 3072  ;;  %p662_p4 = scmp.lt.s32.totalorder %s21_s16, %s21_s16 }
   0x9   :  { %p658_p3 = scmp.ne.s32.totalorder %s21_s16, %s657_s24  ;;  %p663_p5 = scmp.lt.s32.totalorder %s657_s24, %s657_s24 }
   0xb   :  { %p664_p6 = por %p663_p5, %p662_p4 }
   0xd   :  { %p665_p7 = pnand %p664_p6, %p658_p3 }
   0xf   :  { %668 = shalt.err (!%p665_p7)
}
  0x10   :  { %s696_s25 = smov 64   ;;  %s697_s26 = smov 4  }
  0x11   :  { %26 = dma.hbm_to_vmem [thread:$0]  %s802_s2, 3072, %s21_s16, [#allocation3], %s696_s25, %s696_s25, %s697_s26  }
  0x12   :  { %691 = dma.done.wait [#allocation3], 3072  }
  0x13   :  { %692 = vsyncadd [#allocation3], 4294964224  ;;  %v698_v0 = vmov 0   ;;  %v699_v1 = vmov 0.0   ;;  %v35_v2 = vld [vmem:[%s800_s0] sm:$0xff]  ;;  %vm58_vm0 = vcmask 1042432   ;;  %v33_v7 = vlaneseq }
  0x14   :  { %619 = vset.pattern.permute.xlu0 %v698_v0  ;;  %100 = vmatprep.mubr.bf16.mxu0 %v698_v0  ;;  %v44_v3 = vld [vmem:[%s803_s3] sm:$0x77]  ;;  %vm700_vm1 = vmmov 0   ;;  %v622_v9 = vld [vmem:[%s803_s3 + $0x8] ss:$0 sps:$4 sm:$0x77]  }
  0x15   :  { %571 = vmatprep.subr.bf16.mxu1 %v699_v1  ;;  %37 = vperm.xlu0 %619, %v35_v2   ;;  %v487_v4 = vcombine.high %v44_v3, %v44_v3  ;;  %v486_v5 = vcombine.low %v44_v3, %v44_v3  ;;  %v34_v8 = vand.u32 127, %v33_v7  ;;  %vm54_vm3 = vcmask 48128   ;;  %v623_v14 = vld [vmem:[#allocation2] sm:$0xff]   ;;  %v624_v15 = vld [vmem:[#allocation2 + $0x8] sm:$0xff]   ;;  %v625_v16 = vld [vmem:[#allocation2 + $0x10] sm:$0xff]  }
  0x16   :  { %587 = vmatprep.mubr.msk.bf16.mxu1 %vm700_vm1, %v699_v1  ;;  %v66_v13 = vsel %vm58_vm0, %v622_v9, 0  ;;  %v626_v17 = vld [vmem:[#allocation2 + $0x18] sm:$0xff]   ;;  %v627_v18 = vld [vmem:[#allocation2 + $0x20] sm:$0xff]   ;;  %v628_v19 = vld [vmem:[#allocation2 + $0x28] sm:$0xff]  }
  0x17   :  { %489 = vmatprep.subr.msk.bf16.mxu0 %vm58_vm0, %v487_v4  ;;  %v60_v6 = vsel %vm58_vm0, %v486_v5, 0  ;;  %v629_v20 = vld [vmem:[#allocation2 + $0x30] sm:$0xff]   ;;  %v630_v21 = vld [vmem:[#allocation2 + $0x38] sm:$0xff]   ;;  %v43_v22 = vld [vmem:[%s801_s1] sm:$0xf]  ;;  %s701_s1 = smov [#allocation5]  }
  0x18   :  { %69 = vmatpush1.bf16.msra.mxu0 %v60_v6  ;;  %v631_v23 = vld [vmem:[#allocation2 + $0x40] sm:$0xff]   ;;  %v632_v24 = vld [vmem:[#allocation2 + $0x48] sm:$0xff]   ;;  %v633_v25 = vld [vmem:[#allocation2 + $0x50] sm:$0xff]   ;;  %s476_s8 = sshll.u32 %s701_s1, 4  ;;  %s477_s8 = int_to_ptr.vmem [resolvable:$true] %s476_s8 }
  0x19   :  { %545 = vmatprep.subr.bf16.mxu0 %v699_v1  ;;  %572 = vmatpush3.bf16.msra.mxu1 %v631_v23  ;;  %v634_v26 = vld [vmem:[#allocation2 + $0x58] sm:$0xff]   ;;  %v635_v27 = vld [vmem:[#allocation2 + $0x60] sm:$0xff]   ;;  %v636_v28 = vld [vmem:[#allocation2 + $0x68] sm:$0xff]   ;;  %s669_s9 = scalar_lea.vmem %s477_s8, 64  ;;  %p674_p9 = scmp.lt.s32.totalorder %s477_s8, %s477_s8 }
  0x1a   :  { %573 = vmatprep.subr.bf16.mxu1 %v699_v1  ;;  %v637_v29 = vld [vmem:[#allocation2 + $0x70] sm:$0xff]   ;;  %v638_v30 = vld [vmem:[#allocation2 + $0x78] sm:$0xff]   ;;  %v639_v45 = vld [vmem:[#allocation2 + $0x80] sm:$0xff]   ;;  %p670_p8 = scmp.ne.s32.totalorder %s477_s8, %s669_s9  ;;  %p675_p10 = scmp.lt.s32.totalorder %s669_s9, %s669_s9 }
  0x1b   :  { %v640_v47 = vld [vmem:[#allocation2 + $0x88] sm:$0xff]   ;;  %v641_v48 = vld [vmem:[#allocation2 + $0x90] sm:$0xff]   ;;  %v642_v49 = vld [vmem:[#allocation2 + $0x98] sm:$0xff]  }
  0x1c   :  { %v643_v50 = vld [vmem:[#allocation2 + $0xa0] sm:$0xff]   ;;  %v644_v51 = vld [vmem:[#allocation2 + $0xa8] sm:$0xff]   ;;  %v645_v52 = vld [vmem:[#allocation2 + $0xb0] sm:$0xff]   ;;  %p676_p11 = por %p675_p10, %p674_p9 }
  0x1d   :  { %574 = vmatpush3.bf16.msra.mxu1 %v632_v24  ;;  %v646_v53 = vld [vmem:[#allocation2 + $0xb8] sm:$0xff]  }
  0x1e   :  { %575 = vmatprep.subr.bf16.mxu1 %v699_v1  ;;  %p677_p12 = pnand %p676_p11, %p670_p8 }
  0x21   :  { %576 = vmatpush3.bf16.msra.mxu1 %v633_v25 }
  0x22   :  { %577 = vmatprep.subr.bf16.mxu1 %v699_v1 }
  0x25   :  { %578 = vmatpush3.bf16.msra.mxu1 %v634_v26 }
  0x26   :  { %579 = vmatprep.subr.bf16.mxu1 %v699_v1 }
  0x29   :  { %580 = vmatpush3.bf16.msra.mxu1 %v635_v27 }
  0x2a   :  { %581 = vmatprep.subr.bf16.mxu1 %v699_v1 }
  0x2d   :  { %582 = vmatpush3.bf16.msra.mxu1 %v636_v28 }
  0x2e   :  { %583 = vmatprep.subr.bf16.mxu1 %v699_v1 }
  0x31   :  { %584 = vmatpush3.bf16.msra.mxu1 %v637_v29 }
  0x32   :  { %585 = vmatprep.subr.bf16.mxu1 %v699_v1 }
  0x35   :  { %586 = vmatpush3.bf16.msra.mxu1 %v638_v30 }
  0x36   :  { %591 = vmatprep.subr.bf16.mxu1 %v699_v1 }
  0x94   :  { %v38_v10 = vpop.permute.xlu0 %37 }
  0x95   :  { %vm39_vm2 = vcmp.eq.s32.totalorder %v34_v8, %v38_v10 }
  0x96   :  { %v485_v11 = vsel %vm39_vm2, 1.0, %v699_v1 }
  0x97   :  { %v42_v12 = vpack.c.bf16 %v485_v11, %v485_v11 }
  0x99   :  { %490 = vmatmul.mubr.msk.bf16.vlgmr.msra.gmra.mrb[0].mxu0 %vm54_vm3, %v42_v12 }
  0x9a   :  { %546 = vmatpush3.bf16.msra.mxu0 %v66_v13  ;;  %547 = vmatprep.mubr.msk.bf16.mxu0 %vm700_vm1, %v699_v1 }
  0x9b   :  { %551 = vmatprep.subr.bf16.mxu0 %v699_v1 }
  0xa1   :  { %548 = vmatmul.mubr.msk.bf16.vlgmr.msra.gmra.mrb[4].mxu0 %vm54_vm3, %v42_v12 }
  0xa2   :  { %552 = vmatpush3.bf16.msra.mxu0 %v623_v14  ;;  %567 = vmatprep.mubr.msk.bf16.mxu0 %vm700_vm1, %v699_v1 }
  0xa3   :  { %553 = vmatprep.subr.bf16.mxu0 %v699_v1 }
  0xa6   :  { %554 = vmatpush3.bf16.msra.mxu0 %v624_v15 }
  0xa7   :  { %555 = vmatprep.subr.bf16.mxu0 %v699_v1 }
  0xaa   :  { %556 = vmatpush3.bf16.msra.mxu0 %v625_v16 }
  0xab   :  { %557 = vmatprep.subr.bf16.mxu0 %v699_v1 }
  0xae   :  { %558 = vmatpush3.bf16.msra.mxu0 %v626_v17 }
  0xaf   :  { %559 = vmatprep.subr.bf16.mxu0 %v699_v1 }
  0xb2   :  { %560 = vmatpush3.bf16.msra.mxu0 %v627_v18 }
  0xb3   :  { %561 = vmatprep.subr.bf16.mxu0 %v699_v1 }
  0xb6   :  { %562 = vmatpush3.bf16.msra.mxu0 %v628_v19 }
  0xb7   :  { %563 = vmatprep.subr.bf16.mxu0 %v699_v1 }
  0xba   :  { %564 = vmatpush3.bf16.msra.mxu0 %v629_v20 }
  0xbb   :  { %565 = vmatprep.subr.bf16.mxu0 %v699_v1 }
  0xbe   :  { %566 = vmatpush3.bf16.msra.mxu0 %v630_v21 }
  0xc1   :  { %568 = vmatmul.mubr.bf16.vlgmr.msra.gmra.mrb[8].mxu0 %v43_v22 }
 0x16c   :  { %v102_v31 = vpop.f32.mrb[0].mxu0 }
 0x16d   :  { %v104_v32 = vpop.f32.mrb[1].mxu0 }
 0x16e   :  { %v106_v33 = vpop.f32.mrb[2].mxu0 }
 0x16f   :  { %v107_v34 = vpop.f32.mrb[3].mxu0 }
 0x174   :  { %v143_v35 = vpop.f32.mrb[4].mxu0 }
 0x175   :  { %v549_v36 = vpop.f32.mrb[5].mxu0 }
 0x176   :  { %v146_v37 = vpop.f32.mrb[6].mxu0 }
 0x177   :  { %v550_v38 = vpop.f32.mrb[7].mxu0 }
 0x194   :  { %v247_v39 = vpop.f32.mrb[8].mxu0 }
 0x195   :  { %v248_v40 = vadd.f32 %v247_v39, %v102_v31  ;;  %v569_v41 = vpop.f32.mrb[9].mxu0 }
 0x196   :  { %v250_v42 = vpop.f32.mrb[10].mxu0 }
 0x197   :  { %v253_v43 = vmax.f32 %v248_v40, 0.0  ;;  %v570_v44 = vpop.f32.mrb[11].mxu0 }
 0x199   :  { %v254_v46 = vpack.c.bf16 %v253_v43, %v253_v43 }
 0x19b   :  { %588 = vmatmul.mubr.bf16.vlgmr.msra.gmra.mrb[0].mxu1 %v254_v46 }
 0x19c   :  { %592 = vmatpush3.bf16.msra.mxu1 %v639_v45  ;;  %607 = vmatprep.mubr.msk.bf16.mxu1 %vm700_vm1, %v699_v1 }
 0x19d   :  { %593 = vmatprep.subr.bf16.mxu1 %v699_v1 }
 0x1a0   :  { %594 = vmatpush3.bf16.msra.mxu1 %v640_v47 }
 0x1a1   :  { %595 = vmatprep.subr.bf16.mxu1 %v699_v1 }
 0x1a4   :  { %596 = vmatpush3.bf16.msra.mxu1 %v641_v48 }
 0x1a5   :  { %597 = vmatprep.subr.bf16.mxu1 %v699_v1 }
 0x1a8   :  { %598 = vmatpush3.bf16.msra.mxu1 %v642_v49 }
 0x1a9   :  { %599 = vmatprep.subr.bf16.mxu1 %v699_v1 }
 0x1ac   :  { %600 = vmatpush3.bf16.msra.mxu1 %v643_v50 }
 0x1ad   :  { %601 = vmatprep.subr.bf16.mxu1 %v699_v1 }
 0x1b0   :  { %602 = vmatpush3.bf16.msra.mxu1 %v644_v51 }
 0x1b1   :  { %603 = vmatprep.subr.bf16.mxu1 %v699_v1 }
 0x1b4   :  { %604 = vmatpush3.bf16.msra.mxu1 %v645_v52 }
 0x1b5   :  { %605 = vmatprep.subr.bf16.mxu1 %v699_v1 }
 0x1b8   :  { %606 = vmatpush3.bf16.msra.mxu1 %v646_v53 }
 0x26e   :  { %v354_v54 = vpop.f32.mrb[0].mxu1 }
 0x26f   :  { %v355_v55 = vadd.f32 %v354_v54, %v104_v32  ;;  %v589_v56 = vpop.f32.mrb[1].mxu1 }
 0x270   :  { %v357_v57 = vpop.f32.mrb[2].mxu1 }
 0x271   :  { %v360_v58 = vmax.f32 %v355_v55, 0.0  ;;  %v590_v59 = vpop.f32.mrb[3].mxu1 }
 0x273   :  { %v361_v60 = vpack.c.bf16 %v360_v58, %v360_v58 }
 0x275   :  { %608 = vmatmul.mubr.bf16.vlgmr.msra.gmra.mrb[4].mxu1 %v361_v60 }
 0x348   :  { %v461_v61 = vpop.f32.mrb[4].mxu1 }
 0x349   :  { %v462_v62 = vadd.f32 %v461_v61, %v143_v35  ;;  %v609_v63 = vpop.f32.mrb[5].mxu1 }
 0x34a   :  { %v464_v0 = vpop.f32.mrb[6].mxu1 }
 0x34b   :  { %v467_v2 = vmax.f32 %v462_v62, 0.0  ;;  %v610_v3 = vpop.f32.mrb[7].mxu1 }
 0x34d   :  { %v468_v4 = vpack.c.bf16 %v467_v2, %v467_v2 }
 0x34f   :  { %469 = vst [vmem:[#allocation5] sm:$0xf] %v468_v4 }
 0x350   :  { %680 = shalt.err (!%p677_p12)
}
 0x351   :  { %s681_s12 = scalar_lea.hbm %s804_s4, 64 }
 0x352   :  { %p682_p13 = scmp.ne.s32.totalorder %s804_s4, %s681_s12  ;;  %p685_p0 = scmp.lt.u32.totalorder %s681_s12, %s804_s4 }
 0x354   :  { %p687_p1 = pnand %p685_p0, %p682_p13 }
 0x356   :  { %690 = shalt.err (!%p687_p1)
}
 0x357   :  { %479 = dma.vmem_to_hbm [thread:$0]  %s477_s8, 64, %s804_s4, [#allocation4]  }
 0x358   :  { %693 = dma.done.wait [#allocation4], 64  }
 0x359   :  { %694 = vsyncadd [#allocation4], 4294967232 }
 0x35a   :  { %483 = vsyncpa [#allocation3], 1 }
 0x35b   :  { %484 = vsyncpa [#allocation4], 1 }

</bundles_post_ra>
